<compile_context>
chip_gen: v7x
topology: tpu7x:2x2x1
jax: 0.10.0
libtpu: 0.0.40
codegen_flags: <defaults>
</compile_context>

<pallas_src>
import functools
import math

import jax
import jax.numpy as jnp
from jax.experimental import pallas as pl
from jax.experimental.pallas import tpu as pltpu


def mha_kernel(q_ref, k_ref, v_ref,
               wq_ref, bq_ref, wk_ref, bk_ref, wv_ref, bv_ref,
               wj_ref, bj_ref, o_ref, *, heads, batch):
    """Whole problem in one invocation; every ref is a full array resident in VMEM.

    Layout: per-(head, batch) slabs (G, S, hd), G = heads * batch, g = h*batch + b.
    Weights are pre-transposed (y = x @ W) and replicated across batch by the
    wrapper; 1/sqrt(hd) is already folded into wq/bq.
    """
    f32 = jnp.float32

    # Batched per-(head, batch) projections: (G,S,hd) @ (G,hd,hd) -> (G,S,hd).
    q_p = jnp.einsum("gsd,gde->gse", q_ref[...], wq_ref[...],
                     preferred_element_type=f32) + bq_ref[...]
    k_p = jnp.einsum("gsd,gde->gse", k_ref[...], wk_ref[...],
                     preferred_element_type=f32) + bk_ref[...]
    v_p = jnp.einsum("gsd,gde->gse", v_ref[...], wv_ref[...],
                     preferred_element_type=f32) + bv_ref[...]

    # scores[g] = q_p[g] @ k_p[g].T   (1/sqrt(hd) already folded into wq/bq).
    scores = jnp.einsum("gqd,gkd->gqk", q_p, k_p, preferred_element_type=f32)

    # Mask intentionally ignored (reference bug: masked_fill result discarded);
    # dropout is eval-mode identity.  Softmax once on the whole (G, S, S) slab.
    scores = scores - jnp.max(scores, axis=-1, keepdims=True)
    e = jnp.exp(scores)
    denom = jnp.sum(e, axis=-1, keepdims=True)
    attn = e * pl.reciprocal(denom, approx=False)

    ctx = jnp.einsum("gqk,gkd->gqd", attn, v_p, preferred_element_type=f32)

    # Join linear: concat(ctx_h) @ Wj.T + bj  ==  sum_h ctx_h @ Wj.T[h*hd:(h+1)*hd,:],
    # computed as one G-batched matmul followed by a reduction over head slabs
    # (register-resident; no VMEM scratch round-trip, single store to o_ref).
    joined = jnp.einsum("gsd,gdh->gsh", ctx, wj_ref[...],
                        preferred_element_type=f32)            # (G, S, H)
    acc = joined[0:batch]
    for h in range(1, heads):
        acc = acc + joined[h * batch:(h + 1) * batch]
    o_ref[...] = acc + bj_ref[...]


def _split_heads(x, heads, hd):
    """(B, S, H) -> (heads*B, S, hd) with leading dim ordered g = h*B + b."""
    B, S, _ = x.shape
    return (x.reshape(B, S, heads, hd)
             .transpose(2, 0, 1, 3)
             .reshape(heads * B, S, hd))


def _prep_params(params, batch):
    """Pre-transposed, scale-folded, per-head-stacked weights, replicated over B."""
    heads, hd, _ = params["wq"].shape
    H = heads * hd
    scale = 1.0 / math.sqrt(hd)

    def rep_w(w, s=1.0):        # (heads, hd, hd) nn.Linear W -> (G, hd, hd) of s*W.T
        return jnp.repeat(jnp.swapaxes(w, -1, -2) * s, batch, axis=0)

    def rep_b(b, s=1.0):        # (heads, hd) -> (G, 1, hd)
        return jnp.repeat(b * s, batch, axis=0).reshape(heads * batch, 1, hd)

    # join_linear: concat @ Wj.T == sum_h ctx_h @ Wj.T[h*hd:(h+1)*hd, :]
    wj_parts = params["wj"].T.reshape(heads, hd, H)
    wj_g = jnp.repeat(wj_parts, batch, axis=0)                 # (G, hd, H)
    bj = params["bj"].reshape(1, 1, H)

    return (rep_w(params["wq"], scale), rep_b(params["bq"], scale),
            rep_w(params["wk"]), rep_b(params["bk"]),
            rep_w(params["wv"]), rep_b(params["bv"]),
            wj_g, bj)


def multi_head_attention(q, k, v, params, mask=None):
    """q, k, v: (B, S, H) float32.  mask ignored (reference discards masked_fill)."""
    B, S, H = q.shape
    heads, hd, _ = params["wq"].shape
    assert heads * hd == H

    q_g = _split_heads(q, heads, hd)
    k_g = _split_heads(k, heads, hd)
    v_g = _split_heads(v, heads, hd)
    fused = _prep_params(params, B)

    # Whole-array VMEM operands, single invocation: no grid, no double-buffering.
    vmem_spec = pl.BlockSpec(memory_space=pltpu.MemorySpace.VMEM)

    kernel = functools.partial(mha_kernel, heads=heads, batch=B)
    return pl.pallas_call(
        kernel,
        out_shape=jax.ShapeDtypeStruct((B, S, H), jnp.float32),
        in_specs=[vmem_spec] * 11,
        out_specs=vmem_spec,
    )(q_g, k_g, v_g, *fused)


def init_params(key, headcnt, hidden_dim):
    hd = hidden_dim // headcnt
    keys = jax.random.split(key, 8)
    s_head = 1.0 / math.sqrt(hd)
    s_join = 1.0 / math.sqrt(hidden_dim)
    return {
        "wq": jax.random.uniform(keys[0], (headcnt, hd, hd), jnp.float32, -s_head, s_head),
        "bq": jax.random.uniform(keys[1], (headcnt, hd), jnp.float32, -s_head, s_head),
        "wk": jax.random.uniform(keys[2], (headcnt, hd, hd), jnp.float32, -s_head, s_head),
        "bk": jax.random.uniform(keys[3], (headcnt, hd), jnp.float32, -s_head, s_head),
        "wv": jax.random.uniform(keys[4], (headcnt, hd, hd), jnp.float32, -s_head, s_head),
        "bv": jax.random.uniform(keys[5], (headcnt, hd), jnp.float32, -s_head, s_head),
        "wj": jax.random.uniform(keys[6], (hidden_dim, hidden_dim), jnp.float32, -s_join, s_join),
        "bj": jax.random.uniform(keys[7], (hidden_dim,), jnp.float32, -s_join, s_join),
    }


def reference_mha(q, k, v, params):
    """Pure-JAX reference mirroring the PyTorch module (eval mode)."""
    heads, hd, _ = params["wq"].shape
    ctxs = []
    for h in range(heads):
        qh = q[..., h * hd:(h + 1) * hd]
        kh = k[..., h * hd:(h + 1) * hd]
        vh = v[..., h * hd:(h + 1) * hd]
        query = qh @ params["wq"][h].T + params["bq"][h]
        key = kh @ params["wk"][h].T + params["bk"][h]
        value = vh @ params["wv"][h].T + params["bv"][h]
        scores = query @ jnp.swapaxes(key, -1, -2) / math.sqrt(hd)
        attn = jax.nn.softmax(scores, axis=-1)
        ctxs.append(attn @ value)
    concat = jnp.concatenate(ctxs, axis=-1)
    return concat @ params["wj"].T + params["bj"]


if __name__ == "__main__":
    B, S, H, HEADS = 2, 8, 32, 4

    root = jax.random.PRNGKey(0)
    kq, kk, kv, kp = jax.random.split(root, 4)
    q = jax.random.normal(kq, (B, S, H), jnp.float32)
    k = jax.random.normal(kk, (B, S, H), jnp.float32)
    v = jax.random.normal(kv, (B, S, H), jnp.float32)
    params = init_params(kp, HEADS, H)

    out = jax.block_until_ready(multi_head_attention(q, k, v, params))
    ref = reference_mha(q, k, v, params)

    assert out.shape == (B, S, H)
    assert jnp.allclose(out, ref, atol=1e-4, rtol=1e-4), "mismatch vs reference"

    print("KERNEL_OK")
</pallas_src>

<mosaic_0001>
module attributes {stable_mosaic.version = 11 : i64} {
  func.func @mha_kernel(%arg0: memref<8x8x8xf32, #tpu.memory_space<vmem>>, %arg1: memref<8x8x8xf32, #tpu.memory_space<vmem>>, %arg2: memref<8x8x8xf32, #tpu.memory_space<vmem>>, %arg3: memref<8x8x8xf32, #tpu.memory_space<vmem>>, %arg4: memref<8x1x8xf32, #tpu.memory_space<vmem>>, %arg5: memref<8x8x8xf32, #tpu.memory_space<vmem>>, %arg6: memref<8x1x8xf32, #tpu.memory_space<vmem>>, %arg7: memref<8x8x8xf32, #tpu.memory_space<vmem>>, %arg8: memref<8x1x8xf32, #tpu.memory_space<vmem>>, %arg9: memref<8x8x32xf32, #tpu.memory_space<vmem>>, %arg10: memref<1x1x32xf32, #tpu.memory_space<vmem>>, %arg11: memref<2x8x32xf32, #tpu.memory_space<vmem>>) attributes {dimension_semantics = [], scalar_prefetch = 0 : i64, scratch_operands = 0 : i64, tpu.core_type = #tpu.core_type<tc>} {
    %c0 = arith.constant 0 : index
    %c0_0 = arith.constant 0 : index
    %c0_1 = arith.constant 0 : index
    %0 = vector.load %arg0[%c0, %c0_0, %c0_1] : memref<8x8x8xf32, #tpu.memory_space<vmem>>, vector<8x8x8xf32>
    %c0_2 = arith.constant 0 : index
    %c0_3 = arith.constant 0 : index
    %c0_4 = arith.constant 0 : index
    %1 = vector.load %arg3[%c0_2, %c0_3, %c0_4] : memref<8x8x8xf32, #tpu.memory_space<vmem>>, vector<8x8x8xf32>
    "tpu.trace_start"() <{level = 10 : i32, message = "gsd,gde->gse"}> : () -> ()
    %cst = arith.constant dense<0.000000e+00> : vector<8x8x8xf32>
    %2 = tpu.matmul %0, %1, %cst {dimension_numbers = #tpu.dot_dimension_numbers<[2], [1], [1], [2], [0, 0, 0, 1, 1, 2], [0], [0]>} : vector<8x8x8xf32>, vector<8x8x8xf32>, vector<8x8x8xf32> -> vector<8x8x8xf32>
    "tpu.trace_stop"() : () -> ()
    %c0_5 = arith.constant 0 : index
    %c0_6 = arith.constant 0 : index
    %c0_7 = arith.constant 0 : index
    %3 = vector.load %arg4[%c0_5, %c0_6, %c0_7] : memref<8x1x8xf32, #tpu.memory_space<vmem>>, vector<8x1x8xf32>
    %4 = vector.broadcast %3 : vector<8x1x8xf32> to vector<8x8x8xf32>
    %5 = arith.addf %2, %4 : vector<8x8x8xf32>
    %c0_8 = arith.constant 0 : index
    %c0_9 = arith.constant 0 : index
    %c0_10 = arith.constant 0 : index
    %6 = vector.load %arg1[%c0_8, %c0_9, %c0_10] : memref<8x8x8xf32, #tpu.memory_space<vmem>>, vector<8x8x8xf32>
    %c0_11 = arith.constant 0 : index
    %c0_12 = arith.constant 0 : index
    %c0_13 = arith.constant 0 : index
    %7 = vector.load %arg5[%c0_11, %c0_12, %c0_13] : memref<8x8x8xf32, #tpu.memory_space<vmem>>, vector<8x8x8xf32>
    "tpu.trace_start"() <{level = 10 : i32, message = "gsd,gde->gse"}> : () -> ()
    %cst_14 = arith.constant dense<0.000000e+00> : vector<8x8x8xf32>
    %8 = tpu.matmul %6, %7, %cst_14 {dimension_numbers = #tpu.dot_dimension_numbers<[2], [1], [1], [2], [0, 0, 0, 1, 1, 2], [0], [0]>} : vector<8x8x8xf32>, vector<8x8x8xf32>, vector<8x8x8xf32> -> vector<8x8x8xf32>
    "tpu.trace_stop"() : () -> ()
    %c0_15 = arith.constant 0 : index
    %c0_16 = arith.constant 0 : index
    %c0_17 = arith.constant 0 : index
    %9 = vector.load %arg6[%c0_15, %c0_16, %c0_17] : memref<8x1x8xf32, #tpu.memory_space<vmem>>, vector<8x1x8xf32>
    %10 = vector.broadcast %9 : vector<8x1x8xf32> to vector<8x8x8xf32>
    %11 = arith.addf %8, %10 : vector<8x8x8xf32>
    %c0_18 = arith.constant 0 : index
    %c0_19 = arith.constant 0 : index
    %c0_20 = arith.constant 0 : index
    %12 = vector.load %arg2[%c0_18, %c0_19, %c0_20] : memref<8x8x8xf32, #tpu.memory_space<vmem>>, vector<8x8x8xf32>
    %c0_21 = arith.constant 0 : index
    %c0_22 = arith.constant 0 : index
    %c0_23 = arith.constant 0 : index
    %13 = vector.load %arg7[%c0_21, %c0_22, %c0_23] : memref<8x8x8xf32, #tpu.memory_space<vmem>>, vector<8x8x8xf32>
    "tpu.trace_start"() <{level = 10 : i32, message = "gsd,gde->gse"}> : () -> ()
    %cst_24 = arith.constant dense<0.000000e+00> : vector<8x8x8xf32>
    %14 = tpu.matmul %12, %13, %cst_24 {dimension_numbers = #tpu.dot_dimension_numbers<[2], [1], [1], [2], [0, 0, 0, 1, 1, 2], [0], [0]>} : vector<8x8x8xf32>, vector<8x8x8xf32>, vector<8x8x8xf32> -> vector<8x8x8xf32>
    "tpu.trace_stop"() : () -> ()
    %c0_25 = arith.constant 0 : index
    %c0_26 = arith.constant 0 : index
    %c0_27 = arith.constant 0 : index
    %15 = vector.load %arg8[%c0_25, %c0_26, %c0_27] : memref<8x1x8xf32, #tpu.memory_space<vmem>>, vector<8x1x8xf32>
    %16 = vector.broadcast %15 : vector<8x1x8xf32> to vector<8x8x8xf32>
    %17 = arith.addf %14, %16 : vector<8x8x8xf32>
    "tpu.trace_start"() <{level = 10 : i32, message = "gqd,gkd->gqk"}> : () -> ()
    %cst_28 = arith.constant dense<0.000000e+00> : vector<8x8x8xf32>
    %18 = tpu.matmul %5, %11, %cst_28 {dimension_numbers = #tpu.dot_dimension_numbers<[2], [2], [1], [1], [0, 0, 0, 1, 1, 1], [0], [0]>} : vector<8x8x8xf32>, vector<8x8x8xf32>, vector<8x8x8xf32> -> vector<8x8x8xf32>
    "tpu.trace_stop"() : () -> ()
    %cst_29 = arith.constant dense<0xFF800000> : vector<8x8xf32>
    %19 = vector.multi_reduction <maximumf>, %18, %cst_29 [2] : vector<8x8x8xf32> to vector<8x8xf32>
    %20 = vector.shape_cast %19 : vector<8x8xf32> to vector<8x8x1xf32>
    %21 = vector.broadcast %20 : vector<8x8x1xf32> to vector<8x8x8xf32>
    %22 = arith.subf %18, %21 : vector<8x8x8xf32>
    %23 = math.exp %22 : vector<8x8x8xf32>
    %cst_30 = arith.constant dense<0.000000e+00> : vector<8x8xf32>
    %24 = vector.multi_reduction <add>, %23, %cst_30 [2] : vector<8x8x8xf32> to vector<8x8xf32>
    %25 = vector.shape_cast %24 : vector<8x8xf32> to vector<8x8x1xf32>
    %26 = tpu.reciprocal %25 : vector<8x8x1xf32> -> vector<8x8x1xf32>
    %27 = vector.broadcast %26 : vector<8x8x1xf32> to vector<8x8x8xf32>
    %28 = arith.mulf %23, %27 : vector<8x8x8xf32>
    "tpu.trace_start"() <{level = 10 : i32, message = "gqk,gkd->gqd"}> : () -> ()
    %cst_31 = arith.constant dense<0.000000e+00> : vector<8x8x8xf32>
    %29 = tpu.matmul %28, %17, %cst_31 {dimension_numbers = #tpu.dot_dimension_numbers<[2], [1], [1], [2], [0, 0, 0, 1, 1, 2], [0], [0]>} : vector<8x8x8xf32>, vector<8x8x8xf32>, vector<8x8x8xf32> -> vector<8x8x8xf32>
    "tpu.trace_stop"() : () -> ()
    %c0_32 = arith.constant 0 : index
    %c0_33 = arith.constant 0 : index
    %c0_34 = arith.constant 0 : index
    %30 = vector.load %arg9[%c0_32, %c0_33, %c0_34] : memref<8x8x32xf32, #tpu.memory_space<vmem>>, vector<8x8x32xf32>
    "tpu.trace_start"() <{level = 10 : i32, message = "gsd,gdh->gsh"}> : () -> ()
    %cst_35 = arith.constant dense<0.000000e+00> : vector<8x8x32xf32>
    %31 = tpu.matmul %29, %30, %cst_35 {dimension_numbers = #tpu.dot_dimension_numbers<[2], [1], [1], [2], [0, 0, 0, 1, 1, 2], [0], [0]>} : vector<8x8x8xf32>, vector<8x8x32xf32>, vector<8x8x32xf32> -> vector<8x8x32xf32>
    "tpu.trace_stop"() : () -> ()
    %32 = vector.extract_strided_slice %31 {offsets = [0, 0, 0], sizes = [2, 8, 32], strides = [1, 1, 1]} : vector<8x8x32xf32> to vector<2x8x32xf32>
    %33 = vector.extract_strided_slice %31 {offsets = [2, 0, 0], sizes = [2, 8, 32], strides = [1, 1, 1]} : vector<8x8x32xf32> to vector<2x8x32xf32>
    %34 = arith.addf %32, %33 : vector<2x8x32xf32>
    %35 = vector.extract_strided_slice %31 {offsets = [4, 0, 0], sizes = [2, 8, 32], strides = [1, 1, 1]} : vector<8x8x32xf32> to vector<2x8x32xf32>
    %36 = arith.addf %34, %35 : vector<2x8x32xf32>
    %37 = vector.extract_strided_slice %31 {offsets = [6, 0, 0], sizes = [2, 8, 32], strides = [1, 1, 1]} : vector<8x8x32xf32> to vector<2x8x32xf32>
    %38 = arith.addf %36, %37 : vector<2x8x32xf32>
    %c0_36 = arith.constant 0 : index
    %c0_37 = arith.constant 0 : index
    %c0_38 = arith.constant 0 : index
    %39 = vector.load %arg10[%c0_36, %c0_37, %c0_38] : memref<1x1x32xf32, #tpu.memory_space<vmem>>, vector<1x1x32xf32>
    %40 = vector.broadcast %39 : vector<1x1x32xf32> to vector<2x8x32xf32>
    %41 = arith.addf %38, %40 : vector<2x8x32xf32>
    %c0_39 = arith.constant 0 : index
    %c0_40 = arith.constant 0 : index
    %c0_41 = arith.constant 0 : index
    %42 = vector.load %arg11[%c0_39, %c0_40, %c0_41] : memref<2x8x32xf32, #tpu.memory_space<vmem>>, vector<2x8x32xf32>
    tpu.vector_store %arg11[%c0_39, %c0_40, %c0_41], %41 {strides = array<i32>} : memref<2x8x32xf32, #tpu.memory_space<vmem>>, vector<2x8x32xf32>,
    return
  }
}

</mosaic_0001>

<bundles_post_ra>
// kernel: tpu_custom_call.1
= control target key start
LH: loop header
LB: loop body
LE: loop exit
PB: predicated region body
PF: predicated region fallthrough
CT: control target
= control target key end

     0   :  { %16 = vsyncpa [#allocation3], 0  ;;  %s5200_s0 = inlined_call_operand.hbm [shape: f32[8,8,8], index: 0, kind: input, shape index: {}]   ;;  %s5201_s1 = inlined_call_operand.hbm [shape: f32[8,8,8], index: 1, kind: input, shape index: {}]   ;;  %s5202_s2 = inlined_call_operand.hbm [shape: f32[8,8,8], index: 2, kind: input, shape index: {}]   ;;  %s5203_s3 = inlined_call_operand.hbm [shape: f32[8,8,8], index: 3, kind: input, shape index: {}]   ;;  %s5204_s4 = inlined_call_operand.vmem [shape: f32[8,1,8], index: 4, kind: input, shape index: {}]   ;;  %s5205_s5 = inlined_call_operand.hbm [shape: f32[8,8,8], index: 5, kind: input, shape index: {}]   ;;  %s5206_s6 = inlined_call_operand.vmem [shape: f32[8,1,8], index: 6, kind: input, shape index: {}]   ;;  %s5207_s7 = inlined_call_operand.hbm [shape: f32[8,8,8], index: 7, kind: input, shape index: {}]   ;;  %s5208_s8 = inlined_call_operand.vmem [shape: f32[8,1,8], index: 8, kind: input, shape index: {}]   ;;  %s5209_s9 = inlined_call_operand.hbm [shape: f32[8,8,32], index: 9, kind: input, shape index: {}]   ;;  %s5210_s10 = inlined_call_operand.vmem [shape: f32[1,1,32], index: 10, kind: input, shape index: {}]   ;;  %s5211_s11 = inlined_call_operand.hbm [shape: f32[2,8,32], index: 11, kind: output, shape index: {}]  }
   0x1   :  { %17 = vsyncpa [#allocation6], 0 }
   0x2   :  { %18 = vsyncpa [#allocation9], 0 }
   0x3   :  { %19 = vsyncpa [#allocation12], 0 }
   0x4   :  { %20 = vsyncpa [#allocation4], 0  ;;  %s4660_s17 = smov [#allocation5]   ;;  %s4661_s19 = smov [#allocation8]  }
   0x5   :  { %s38_s18 = sshll.u32 %s4660_s17, 4  ;;  %s62_s20 = sshll.u32 %s4661_s19, 4  ;;  %s39_s18 = int_to_ptr.vmem [resolvable:$true] %s38_s18  ;;  %s4732_s20 = int_to_ptr.vmem [resolvable:$true] %s62_s20 }
   0x6   :  { %s4474_s23 = scalar_lea.hbm %s5201_s1, 1024 }
   0x7   :  { %p4475_p0 = scmp.ne.s32.totalorder %s5201_s1, %s4474_s23  ;;  %p4478_p1 = scmp.lt.u32.totalorder %s4474_s23, %s5201_s1 }
   0x9   :  { %p4480_p2 = pnand %p4478_p1, %p4475_p0 }
   0xb   :  { %4483 = shalt.err (!%p4480_p2)
}
   0xc   :  { %s4484_s28 = scalar_lea.vmem %s39_s18, 1024  ;;  %p4489_p4 = scmp.lt.s32.totalorder %s39_s18, %s39_s18 }
   0xd   :  { %p4485_p3 = scmp.ne.s32.totalorder %s39_s18, %s4484_s28  ;;  %p4490_p5 = scmp.lt.s32.totalorder %s4484_s28, %s4484_s28 }
   0xf   :  { %p4491_p6 = por %p4490_p5, %p4489_p4 }
  0x11   :  { %p4492_p7 = pnand %p4491_p6, %p4485_p3 }
  0x13   :  { %4495 = shalt.err (!%p4492_p7)
}
  0x14   :  { %s4662_s29 = smov 128   ;;  %s4663_s30 = smov 8  }
  0x15   :  { %44 = dma.hbm_to_vmem [thread:$0]  %s5201_s1, 1024, %s39_s18, [#allocation6], %s4662_s29, %s4662_s29, %s4663_s30  }
  0x16   :  { %s4496_s16 = scalar_lea.hbm %s5203_s3, 1024 }
  0x17   :  { %p4497_p8 = scmp.ne.s32.totalorder %s5203_s3, %s4496_s16  ;;  %p4500_p9 = scmp.lt.u32.totalorder %s4496_s16, %s5203_s3 }
  0x19   :  { %p4502_p10 = pnand %p4500_p9, %p4497_p8 }
  0x1b   :  { %4505 = shalt.err (!%p4502_p10)
}
  0x1c   :  { %s4506_s23 = scalar_lea.vmem %s4732_s20, 1024  ;;  %p4511_p12 = scmp.lt.s32.totalorder %s4732_s20, %s4732_s20 }
  0x1d   :  { %p4507_p11 = scmp.ne.s32.totalorder %s4732_s20, %s4506_s23  ;;  %p4512_p13 = scmp.lt.s32.totalorder %s4506_s23, %s4506_s23 }
  0x1f   :  { %p4513_p0 = por %p4512_p13, %p4511_p12 }
  0x21   :  { %p4514_p1 = pnand %p4513_p0, %p4507_p11 }
  0x23   :  { %4517 = shalt.err (!%p4514_p1)
}
  0x24   :  { %68 = dma.hbm_to_vmem [thread:$0]  %s5203_s3, 1024, %s4732_s20, [#allocation9], %s4662_s29, %s4662_s29, %s4663_s30  }
  0x25   :  { %s4664_s24 = smov [#allocation11]   ;;  %s4665_s26 = smov [#allocation2]  }
  0x26   :  { %s90_s25 = sshll.u32 %s4664_s24, 4  ;;  %s26_s27 = sshll.u32 %s4665_s26, 4  ;;  %s91_s25 = int_to_ptr.vmem [resolvable:$true] %s90_s25  ;;  %s4769_s27 = int_to_ptr.vmem [resolvable:$true] %s26_s27 }
  0x27   :  { %s4518_s13 = scalar_lea.hbm %s5207_s7, 1024 }
  0x28   :  { %p4519_p2 = scmp.ne.s32.totalorder %s5207_s7, %s4518_s13  ;;  %p4522_p3 = scmp.lt.u32.totalorder %s4518_s13, %s5207_s7 }
  0x2a   :  { %p4524_p4 = pnand %p4522_p3, %p4519_p2 }
  0x2c   :  { %4527 = shalt.err (!%p4524_p4)
}
  0x2d   :  { %s4528_s3 = scalar_lea.vmem %s91_s25, 1024  ;;  %p4533_p6 = scmp.lt.s32.totalorder %s91_s25, %s91_s25 }
  0x2e   :  { %p4529_p5 = scmp.ne.s32.totalorder %s91_s25, %s4528_s3  ;;  %p4534_p7 = scmp.lt.s32.totalorder %s4528_s3, %s4528_s3 }
  0x30   :  { %p4535_p8 = por %p4534_p7, %p4533_p6 }
  0x32   :  { %p4536_p9 = pnand %p4535_p8, %p4529_p5 }
  0x34   :  { %4539 = shalt.err (!%p4536_p9)
}
  0x35   :  { %96 = dma.hbm_to_vmem [thread:$0]  %s5207_s7, 1024, %s91_s25, [#allocation12], %s4662_s29, %s4662_s29, %s4663_s30  }
  0x36   :  { %s4540_s23 = scalar_lea.hbm %s5200_s0, 1024 }
  0x37   :  { %p4541_p10 = scmp.ne.s32.totalorder %s5200_s0, %s4540_s23  ;;  %p4544_p11 = scmp.lt.u32.totalorder %s4540_s23, %s5200_s0 }
  0x39   :  { %p4546_p12 = pnand %p4544_p11, %p4541_p10 }
  0x3b   :  { %4549 = shalt.err (!%p4546_p12)
}
  0x3c   :  { %s4550_s28 = scalar_lea.vmem %s4769_s27, 1024  ;;  %p4555_p0 = scmp.lt.s32.totalorder %s4769_s27, %s4769_s27 }
  0x3d   :  { %p4551_p13 = scmp.ne.s32.totalorder %s4769_s27, %s4550_s28  ;;  %p4556_p1 = scmp.lt.s32.totalorder %s4550_s28, %s4550_s28 }
  0x3f   :  { %p4557_p2 = por %p4556_p1, %p4555_p0 }
  0x41   :  { %p4558_p3 = pnand %p4557_p2, %p4551_p13 }
  0x43   :  { %4561 = shalt.err (!%p4558_p3)
}
  0x44   :  { %32 = dma.hbm_to_vmem [thread:$0]  %s5200_s0, 1024, %s4769_s27, [#allocation3], %s4662_s29, %s4662_s29, %s4663_s30  }
  0x45   :  { %s4666_s12 = smov [#allocation7]   ;;  %s4667_s14 = smov [#allocation10]  }
  0x46   :  { %s50_s13 = sshll.u32 %s4666_s12, 4  ;;  %s76_s15 = sshll.u32 %s4667_s14, 4  ;;  %s51_s13 = int_to_ptr.vmem [resolvable:$true] %s50_s13  ;;  %s4806_s15 = int_to_ptr.vmem [resolvable:$true] %s76_s15 }
  0x47   :  { %s4562_s3 = scalar_lea.hbm %s5202_s2, 1024 }
  0x48   :  { %p4563_p4 = scmp.ne.s32.totalorder %s5202_s2, %s4562_s3  ;;  %p4566_p5 = scmp.lt.u32.totalorder %s4562_s3, %s5202_s2 }
  0x4a   :  { %p4568_p6 = pnand %p4566_p5, %p4563_p4 }
  0x4c   :  { %4571 = shalt.err (!%p4568_p6)
}
  0x4d   :  { %s4572_s0 = scalar_lea.vmem %s51_s13, 1024  ;;  %p4577_p8 = scmp.lt.s32.totalorder %s51_s13, %s51_s13 }
  0x4e   :  { %p4573_p7 = scmp.ne.s32.totalorder %s51_s13, %s4572_s0  ;;  %p4578_p9 = scmp.lt.s32.totalorder %s4572_s0, %s4572_s0 }
  0x50   :  { %p4579_p10 = por %p4578_p9, %p4577_p8 }
  0x52   :  { %p4580_p11 = pnand %p4579_p10, %p4573_p7 }
  0x54   :  { %4583 = shalt.err (!%p4580_p11)
}
  0x55   :  { %56 = dma.hbm_to_vmem [thread:$0]  %s5202_s2, 1024, %s51_s13, [#allocation6], %s4662_s29, %s4662_s29, %s4663_s30  }
  0x56   :  { %s4584_s24 = scalar_lea.hbm %s5205_s5, 1024 }
  0x57   :  { %p4585_p12 = scmp.ne.s32.totalorder %s5205_s5, %s4584_s24  ;;  %p4588_p13 = scmp.lt.u32.totalorder %s4584_s24, %s5205_s5 }
  0x59   :  { %p4590_p0 = pnand %p4588_p13, %p4585_p12 }
  0x5b   :  { %4593 = shalt.err (!%p4590_p0)
}
  0x5c   :  { %s4594_s12 = scalar_lea.vmem %s4806_s15, 1024  ;;  %p4599_p2 = scmp.lt.s32.totalorder %s4806_s15, %s4806_s15 }
  0x5d   :  { %p4595_p1 = scmp.ne.s32.totalorder %s4806_s15, %s4594_s12  ;;  %p4600_p3 = scmp.lt.s32.totalorder %s4594_s12, %s4594_s12 }
  0x5f   :  { %p4601_p4 = por %p4600_p3, %p4599_p2 }
  0x61   :  { %p4602_p5 = pnand %p4601_p4, %p4595_p1 }
  0x63   :  { %4605 = shalt.err (!%p4602_p5)
}
  0x64   :  { %82 = dma.hbm_to_vmem [thread:$0]  %s5205_s5, 1024, %s4806_s15, [#allocation9], %s4662_s29, %s4662_s29, %s4663_s30  }
  0x65   :  { %s4668_s14 = smov [#allocation13]   ;;  %s4606_s20 = scalar_lea.hbm %s5209_s9, 1024 }
  0x66   :  { %s104_s16 = sshll.u32 %s4668_s14, 4  ;;  %p4607_p6 = scmp.ne.s32.totalorder %s5209_s9, %s4606_s20  ;;  %s105_s16 = int_to_ptr.vmem [resolvable:$true] %s104_s16 }
  0x67   :  { %p4610_p7 = scmp.lt.u32.totalorder %s4606_s20, %s5209_s9 }
  0x69   :  { %p4612_p8 = pnand %p4610_p7, %p4607_p6 }
  0x6b   :  { %4615 = shalt.err (!%p4612_p8)
}
  0x6c   :  { %s4616_s27 = scalar_lea.vmem %s105_s16, 1024  ;;  %p4621_p10 = scmp.lt.s32.totalorder %s105_s16, %s105_s16 }
  0x6d   :  { %p4617_p9 = scmp.ne.s32.totalorder %s105_s16, %s4616_s27  ;;  %p4622_p11 = scmp.lt.s32.totalorder %s4616_s27, %s4616_s27 }
  0x6f   :  { %p4623_p12 = por %p4622_p11, %p4621_p10 }
  0x71   :  { %p4624_p13 = pnand %p4623_p12, %p4617_p9 }
  0x73   :  { %4627 = shalt.err (!%p4624_p13)
}
  0x74   :  { %110 = dma.hbm_to_vmem [thread:$0]  %s5209_s9, 1024, %s105_s16, [#allocation12], %s4662_s29, %s4662_s29, %s4663_s30  }
  0x75   :  { %4650 = dma.done.wait [#allocation3], 1024  }
  0x76   :  { %4651 = vsyncadd [#allocation3], 4294966272 }
  0x77   :  { %4652 = dma.done.wait [#allocation6], 2048  }
  0x78   :  { %4653 = vsyncadd [#allocation6], 4294965248 }
  0x79   :  { %4654 = dma.done.wait [#allocation9], 2048  }
  0x7a   :  { %4655 = vsyncadd [#allocation9], 4294965248 }
  0x7b   :  { %4656 = dma.done.wait [#allocation12], 2048  }
  0x7c   :  { %4657 = vsyncadd [#allocation12], 4294965248  ;;  %v4669_v0 = vmov 0.0   ;;  %vm4670_vm0 = vmmov 0   ;;  %vm206_vm1 = vcmask 64512   ;;  %v142_v1 = vld [vmem:[#allocation8] sm:$0xff] }
  0x7d   :  { %4190 = vmatprep.subr.mxu0 %v4669_v0  ;;  %4195 = vmatprep.subr.mxu1 %v4669_v0  ;;  %v143_v2 = vld [vmem:[#allocation8 + $0x8] sm:$0xff]  ;;  %v134_v3 = vld [vmem:[#allocation2] sm:$0xff]  ;;  %v144_v5 = vld [vmem:[#allocation8 + $0x10] sm:$0xff]  ;;  %vm3990_vm2 = vcmask 261120   ;;  %s4671_s15 = smov [#allocation14]  }
  0x7e   :  { %4192 = vmatprep.mubr.msk.f32.mxu0 %vm4670_vm0, %v4669_v0  ;;  %4197 = vmatprep.mubr.msk.f32.mxu1 %vm4670_vm0, %v4669_v0  ;;  %v135_v4 = vld [vmem:[#allocation2 + $0x8] sm:$0xff]  ;;  %v145_v6 = vld [vmem:[#allocation8 + $0x18] sm:$0xff]  ;;  %v136_v7 = vld [vmem:[#allocation2 + $0x10] sm:$0xff]  ;;  %s3998_s9 = sshll.u32 %s4671_s15, 4  ;;  %s3999_s9 = int_to_ptr.vmem [resolvable:$true] %s3998_s9 }
  0x7f   :  { %4191 = vmatpush3.msra.mxu0 %v142_v1  ;;  %4196 = vmatpush3.msra.mxu1 %v143_v2  ;;  %v137_v8 = vld [vmem:[#allocation2 + $0x18] sm:$0xff]  ;;  %v146_v9 = vld [vmem:[#allocation8 + $0x20] sm:$0xff]  ;;  %v147_v10 = vld [vmem:[#allocation8 + $0x28] sm:$0xff]  ;;  %s4628_s23 = scalar_lea.vmem %s3999_s9, 256  ;;  %p4633_p1 = scmp.lt.s32.totalorder %s3999_s9, %s3999_s9 }
  0x80   :  { %4193 = vmatmul.mubr.msk.f32.vlgmr.msra.gmra.mrb[0].mxu0 %vm206_vm1, %v134_v3  ;;  %4198 = vmatmul.mubr.msk.f32.vlgmr.msra.gmra.mrb[0].mxu1 %vm206_vm1, %v135_v4  ;;  %v138_v11 = vld [vmem:[#allocation2 + $0x20] sm:$0xff]  ;;  %v139_v12 = vld [vmem:[#allocation2 + $0x28] sm:$0xff]  ;;  %v148_v13 = vld [vmem:[#allocation8 + $0x30] sm:$0xff]  ;;  %p4629_p0 = scmp.ne.s32.totalorder %s3999_s9, %s4628_s23  ;;  %p4634_p2 = scmp.lt.s32.totalorder %s4628_s23, %s4628_s23 }
  0x81   :  { %4200 = vmatprep.subr.mxu0 %v4669_v0  ;;  %4205 = vmatprep.subr.mxu1 %v4669_v0  ;;  %v149_v14 = vld [vmem:[#allocation8 + $0x38] sm:$0xff]  ;;  %v140_v15 = vld [vmem:[#allocation2 + $0x30] sm:$0xff]  ;;  %v799_v17 = vld [vmem:[#allocation10] sm:$0xff] }
  0x82   :  { %4201 = vmatpush3.msra.mxu0 %v144_v5  ;;  %4202 = vmatprep.mubr.msk.f32.mxu0 %vm4670_vm0, %v4669_v0  ;;  %v141_v16 = vld [vmem:[#allocation2 + $0x38] sm:$0xff]  ;;  %v800_v18 = vld [vmem:[#allocation10 + $0x8] sm:$0xff]  ;;  %v791_v19 = vld [vmem:[#allocation5] sm:$0xff]  ;;  %p4635_p3 = por %p4634_p2, %p4633_p1 }
  0x83   :  { %4206 = vmatpush3.msra.mxu1 %v145_v6  ;;  %4207 = vmatprep.mubr.msk.f32.mxu1 %vm4670_vm0, %v4669_v0  ;;  %v792_v20 = vld [vmem:[#allocation5 + $0x8] sm:$0xff]  ;;  %v801_v21 = vld [vmem:[#allocation10 + $0x10] sm:$0xff]  ;;  %v802_v22 = vld [vmem:[#allocation10 + $0x18] sm:$0xff] }
  0x84   :  { %4203 = vmatmul.mubr.msk.f32.vlgmr.msra.gmra.mrb[2].mxu0 %vm206_vm1, %v136_v7  ;;  %4208 = vmatmul.mubr.msk.f32.vlgmr.msra.gmra.mrb[2].mxu1 %vm206_vm1, %v137_v8  ;;  %v793_v23 = vld [vmem:[#allocation5 + $0x10] sm:$0xff]  ;;  %v794_v24 = vld [vmem:[#allocation5 + $0x18] sm:$0xff]  ;;  %v803_v25 = vld [vmem:[#allocation10 + $0x20] sm:$0xff]  ;;  %p4636_p4 = pnand %p4635_p3, %p4629_p0 }
  0x85   :  { %4210 = vmatprep.subr.mxu0 %v4669_v0  ;;  %4215 = vmatprep.subr.mxu1 %v4669_v0  ;;  %v804_v26 = vld [vmem:[#allocation10 + $0x28] sm:$0xff]  ;;  %v795_v27 = vld [vmem:[#allocation5 + $0x20] sm:$0xff]  ;;  %v805_v29 = vld [vmem:[#allocation10 + $0x30] sm:$0xff] }
  0x86   :  { %4211 = vmatpush3.msra.mxu0 %v146_v9  ;;  %4212 = vmatprep.mubr.msk.f32.mxu0 %vm4670_vm0, %v4669_v0  ;;  %v796_v28 = vld [vmem:[#allocation5 + $0x28] sm:$0xff]  ;;  %v806_v30 = vld [vmem:[#allocation10 + $0x38] sm:$0xff]  ;;  %v797_v31 = vld [vmem:[#allocation5 + $0x30] sm:$0xff] }
  0x87   :  { %4216 = vmatpush3.msra.mxu1 %v147_v10  ;;  %4217 = vmatprep.mubr.msk.f32.mxu1 %vm4670_vm0, %v4669_v0  ;;  %v798_v32 = vld [vmem:[#allocation5 + $0x38] sm:$0xff]  ;;  %v1455_v33 = vld [vmem:[#allocation11] sm:$0xff]  ;;  %v1456_v35 = vld [vmem:[#allocation11 + $0x8] sm:$0xff] }
  0x88   :  { %4213 = vmatmul.mubr.msk.f32.vlgmr.msra.gmra.mrb[4].mxu0 %vm206_vm1, %v138_v11  ;;  %4218 = vmatmul.mubr.msk.f32.vlgmr.msra.gmra.mrb[4].mxu1 %vm206_vm1, %v139_v12  ;;  %v1447_v34 = vld [vmem:[#allocation7] sm:$0xff]  ;;  %v1448_v36 = vld [vmem:[#allocation7 + $0x8] sm:$0xff]  ;;  %v1457_v37 = vld [vmem:[#allocation11 + $0x10] sm:$0xff] }
  0x89   :  { %4220 = vmatprep.subr.mxu0 %v4669_v0  ;;  %4225 = vmatprep.subr.mxu1 %v4669_v0  ;;  %v1449_v38 = vld [vmem:[#allocation7 + $0x10] sm:$0xff]  ;;  %v1458_v39 = vld [vmem:[#allocation11 + $0x18] sm:$0xff]  ;;  %v1459_v41 = vld [vmem:[#allocation11 + $0x20] sm:$0xff] }
  0x8a   :  { %4221 = vmatpush3.msra.mxu0 %v148_v13  ;;  %4222 = vmatprep.mubr.msk.f32.mxu0 %vm4670_vm0, %v4669_v0  ;;  %v1450_v40 = vld [vmem:[#allocation7 + $0x18] sm:$0xff]  ;;  %v1460_v42 = vld [vmem:[#allocation11 + $0x28] sm:$0xff]  ;;  %v1451_v43 = vld [vmem:[#allocation7 + $0x20] sm:$0xff] }
  0x8b   :  { %4226 = vmatpush3.msra.mxu1 %v149_v14  ;;  %4227 = vmatprep.mubr.msk.f32.mxu1 %vm4670_vm0, %v4669_v0  ;;  %v1452_v44 = vld [vmem:[#allocation7 + $0x28] sm:$0xff]  ;;  %v1461_v45 = vld [vmem:[#allocation11 + $0x30] sm:$0xff]  ;;  %v1462_v46 = vld [vmem:[#allocation11 + $0x38] sm:$0xff] }
  0x8c   :  { %4223 = vmatmul.mubr.msk.f32.vlgmr.msra.gmra.mrb[6].mxu0 %vm206_vm1, %v140_v15  ;;  %4228 = vmatmul.mubr.msk.f32.vlgmr.msra.gmra.mrb[6].mxu1 %vm206_vm1, %v141_v16  ;;  %v1453_v47 = vld [vmem:[#allocation7 + $0x30] sm:$0xff]  ;;  %v1454_v48 = vld [vmem:[#allocation7 + $0x38] sm:$0xff]  ;;  %v4029_v2 = vld [vmem:[%s5206_s6] ss:$0 sm:$0xff] }
  0x8d   :  { %4230 = vmatprep.subr.mxu0 %v4669_v0  ;;  %4235 = vmatprep.subr.mxu1 %v4669_v0  ;;  %v4030_v3 = vld [vmem:[%s5206_s6 + $0x1] ss:$0 sm:$0xff]  ;;  %v4013_v6 = vld [vmem:[%s5204_s4] ss:$0 sm:$0xff]  ;;  %v4031_v12 = vld [vmem:[%s5206_s6 + $0x2] ss:$0 sm:$0xff] }
  0x8e   :  { %4231 = vmatpush3.msra.mxu0 %v799_v17  ;;  %4232 = vmatprep.mubr.msk.f32.mxu0 %vm4670_vm0, %v4669_v0  ;;  %v4014_v7 = vld [vmem:[%s5204_s4 + $0x1] ss:$0 sm:$0xff]  ;;  %v4032_v13 = vld [vmem:[%s5206_s6 + $0x3] ss:$0 sm:$0xff] }
  0x8f   :  { %4236 = vmatpush3.msra.mxu1 %v800_v18  ;;  %4237 = vmatprep.mubr.msk.f32.mxu1 %vm4670_vm0, %v4669_v0  ;;  %v4015_v18 = vld [vmem:[%s5204_s4 + $0x2] ss:$0 sm:$0xff] }
  0x90   :  { %4233 = vmatmul.mubr.msk.f32.vlgmr.msra.gmra.mrb[8].mxu0 %vm206_vm1, %v791_v19  ;;  %4238 = vmatmul.mubr.msk.f32.vlgmr.msra.gmra.mrb[8].mxu1 %vm206_vm1, %v792_v20  ;;  %v4016_v19 = vld [vmem:[%s5204_s4 + $0x3] ss:$0 sm:$0xff] }
  0x91   :  { %4240 = vmatprep.subr.mxu0 %v4669_v0  ;;  %4245 = vmatprep.subr.mxu1 %v4669_v0 }
  0x92   :  { %4241 = vmatpush3.msra.mxu0 %v801_v21  ;;  %4242 = vmatprep.mubr.msk.f32.mxu0 %vm4670_vm0, %v4669_v0 }
  0x93   :  { %4246 = vmatpush3.msra.mxu1 %v802_v22  ;;  %4247 = vmatprep.mubr.msk.f32.mxu1 %vm4670_vm0, %v4669_v0 }
  0x94   :  { %4243 = vmatmul.mubr.msk.f32.vlgmr.msra.gmra.mrb[10].mxu0 %vm206_vm1, %v793_v23  ;;  %4248 = vmatmul.mubr.msk.f32.vlgmr.msra.gmra.mrb[10].mxu1 %vm206_vm1, %v794_v24  ;;  %v4033_v24 = vld [vmem:[%s5206_s6 + $0x4] ss:$0 sm:$0xff] }
  0x95   :  { %4250 = vmatprep.subr.mxu0 %v4669_v0  ;;  %4255 = vmatprep.subr.mxu1 %v4669_v0 }
  0x96   :  { %4251 = vmatpush3.msra.mxu0 %v803_v25  ;;  %4252 = vmatprep.mubr.msk.f32.mxu0 %vm4670_vm0, %v4669_v0  ;;  %v4034_v25 = vld [vmem:[%s5206_s6 + $0x5] ss:$0 sm:$0xff] }
  0x97   :  { %4256 = vmatpush3.msra.mxu1 %v804_v26  ;;  %4257 = vmatprep.mubr.msk.f32.mxu1 %vm4670_vm0, %v4669_v0 }
  0x98   :  { %4253 = vmatmul.mubr.msk.f32.vlgmr.msra.gmra.mrb[12].mxu0 %vm206_vm1, %v795_v27  ;;  %4258 = vmatmul.mubr.msk.f32.vlgmr.msra.gmra.mrb[12].mxu1 %vm206_vm1, %v796_v28 }
  0x99   :  { %4260 = vmatprep.subr.mxu0 %v4669_v0  ;;  %4265 = vmatprep.subr.mxu1 %v4669_v0 }
  0x9a   :  { %4261 = vmatpush3.msra.mxu0 %v805_v29  ;;  %4262 = vmatprep.mubr.msk.f32.mxu0 %vm4670_vm0, %v4669_v0 }
  0x9b   :  { %4266 = vmatpush3.msra.mxu1 %v806_v30  ;;  %4267 = vmatprep.mubr.msk.f32.mxu1 %vm4670_vm0, %v4669_v0  ;;  %v4017_v30 = vld [vmem:[%s5204_s4 + $0x4] ss:$0 sm:$0xff] }
  0x9c   :  { %4263 = vmatmul.mubr.msk.f32.vlgmr.msra.gmra.mrb[14].mxu0 %vm206_vm1, %v797_v31  ;;  %4268 = vmatmul.mubr.msk.f32.vlgmr.msra.gmra.mrb[14].mxu1 %vm206_vm1, %v798_v32  ;;  %v4018_v31 = vld [vmem:[%s5204_s4 + $0x5] ss:$0 sm:$0xff] }
  0x9d   :  { %4270 = vmatprep.subr.mxu0 %v4669_v0  ;;  %4272 = vmatprep.mubr.msk.f32.mxu0 %vm4670_vm0, %v4669_v0 }
  0x9e   :  { %4275 = vmatprep.subr.mxu1 %v4669_v0  ;;  %4277 = vmatprep.mubr.msk.f32.mxu1 %vm4670_vm0, %v4669_v0 }
  0x9f   :  { %4271 = vmatpush3.msra.mxu0 %v1455_v33  ;;  %4276 = vmatpush3.msra.mxu1 %v1456_v35 }
  0xa0   :  { %4273 = vmatmul.mubr.msk.f32.vlgmr.msra.gmra.mrb[16].mxu0 %vm206_vm1, %v1447_v34  ;;  %4278 = vmatmul.mubr.msk.f32.vlgmr.msra.gmra.mrb[16].mxu1 %vm206_vm1, %v1448_v36  ;;  %v4035_v36 = vld [vmem:[%s5206_s6 + $0x6] ss:$0 sm:$0xff] }
  0xa1   :  { %4280 = vmatprep.subr.mxu0 %v4669_v0  ;;  %4282 = vmatprep.mubr.msk.f32.mxu0 %vm4670_vm0, %v4669_v0 }
  0xa2   :  { %4285 = vmatprep.subr.mxu1 %v4669_v0  ;;  %4281 = vmatpush3.msra.mxu0 %v1457_v37  ;;  %v4036_v37 = vld [vmem:[%s5206_s6 + $0x7] ss:$0 sm:$0xff] }
  0xa3   :  { %4287 = vmatprep.mubr.msk.f32.mxu1 %vm4670_vm0, %v4669_v0  ;;  %4286 = vmatpush3.msra.mxu1 %v1458_v39 }
  0xa4   :  { %4283 = vmatmul.mubr.msk.f32.vlgmr.msra.gmra.mrb[18].mxu0 %vm206_vm1, %v1449_v38  ;;  %4288 = vmatmul.mubr.msk.f32.vlgmr.msra.gmra.mrb[18].mxu1 %vm206_vm1, %v1450_v40 }
  0xa5   :  { %4290 = vmatprep.subr.mxu0 %v4669_v0  ;;  %4295 = vmatprep.subr.mxu1 %v4669_v0 }
  0xa6   :  { %4292 = vmatprep.mubr.msk.f32.mxu0 %vm4670_vm0, %v4669_v0  ;;  %4291 = vmatpush3.msra.mxu0 %v1459_v41 }
  0xa7   :  { %4296 = vmatpush3.msra.mxu1 %v1460_v42  ;;  %4297 = vmatprep.mubr.msk.f32.mxu1 %vm4670_vm0, %v4669_v0  ;;  %v4019_v42 = vld [vmem:[%s5204_s4 + $0x6] ss:$0 sm:$0xff] }
  0xa8   :  { %4293 = vmatmul.mubr.msk.f32.vlgmr.msra.gmra.mrb[20].mxu0 %vm206_vm1, %v1451_v43  ;;  %4300 = vmatprep.subr.mxu0 %v4669_v0  ;;  %v4020_v43 = vld [vmem:[%s5204_s4 + $0x7] ss:$0 sm:$0xff] }
  0xa9   :  { %4305 = vmatprep.subr.mxu1 %v4669_v0  ;;  %4298 = vmatmul.mubr.msk.f32.vlgmr.msra.gmra.mrb[20].mxu1 %vm206_vm1, %v1452_v44 }
  0xaa   :  { %4301 = vmatpush3.msra.mxu0 %v1461_v45  ;;  %4306 = vmatpush3.msra.mxu1 %v1462_v46 }
  0xab   :  { %4302 = vmatprep.mubr.msk.f32.mxu0 %vm4670_vm0, %v4669_v0  ;;  %4307 = vmatprep.mubr.msk.f32.mxu1 %vm4670_vm0, %v4669_v0 }
  0xac   :  { %4310 = vmatprep.subr.mxu0 %v4669_v0  ;;  %4315 = vmatprep.subr.mxu1 %v4669_v0 }
  0xad   :  { %4303 = vmatmul.mubr.msk.f32.vlgmr.msra.gmra.mrb[22].mxu0 %vm206_vm1, %v1453_v47  ;;  %4308 = vmatmul.mubr.msk.f32.vlgmr.msra.gmra.mrb[22].mxu1 %vm206_vm1, %v1454_v48 }
  0xae   :  { %4312 = vmatprep.mubr.msk.f32.mxu0 %vm4670_vm0, %v4669_v0  ;;  %4317 = vmatprep.mubr.msk.f32.mxu1 %vm4670_vm0, %v4669_v0 }
 0x153   :  { %v276_v49 = vpop.f32.mrb[0].mxu0  ;;  %v349_v50 = vpop.f32.mrb[0].mxu1 }
 0x154   :  { %v4194_v51 = vpop.f32.mrb[1].mxu0  ;;  %v4199_v52 = vpop.f32.mrb[1].mxu1  ;;  %v277_v14 = vadd.f32 %v4013_v6, %v276_v49  ;;  %v350_v15 = vadd.f32 %v4014_v7, %v349_v50  ;;  %v4045_v50 = vld [vmem:[%s5208_s8] ss:$0 sm:$0xff] }
 0x155   :  { %v4046_v51 = vld [vmem:[%s5208_s8 + $0x1] ss:$0 sm:$0xff] }
 0x157   :  { %v422_v53 = vpop.f32.mrb[2].mxu0  ;;  %v495_v54 = vpop.f32.mrb[2].mxu1 }
 0x158   :  { %v4204_v55 = vpop.f32.mrb[3].mxu0  ;;  %v4209_v56 = vpop.f32.mrb[3].mxu1  ;;  %v423_v26 = vadd.f32 %v4015_v18, %v422_v53  ;;  %v496_v27 = vadd.f32 %v4016_v19, %v495_v54 }
 0x15b   :  { %v568_v57 = vpop.f32.mrb[4].mxu0  ;;  %v641_v58 = vpop.f32.mrb[4].mxu1 }
 0x15c   :  { %v4214_v59 = vpop.f32.mrb[5].mxu0  ;;  %v4219_v60 = vpop.f32.mrb[5].mxu1  ;;  %v569_v38 = vadd.f32 %v4017_v30, %v568_v57  ;;  %v642_v39 = vadd.f32 %v4018_v31, %v641_v58 }
 0x15f   :  { %v4960_v61 = vpop.f32.mrb[6].mxu0  ;;  %v4962_v62 = vpop.f32.mrb[6].mxu1 }
 0x160   :  { %v4224_v63 = vpop.f32.mrb[7].mxu0  ;;  %v4229_v1 = vpop.f32.mrb[7].mxu1  ;;  %v715_v48 = vadd.f32 %v4019_v42, %v4960_v61  ;;  %v788_v49 = vadd.f32 %v4020_v43, %v4962_v62 }
 0x163   :  { %v932_v4 = vpop.f32.mrb[8].mxu0  ;;  %v1005_v5 = vpop.f32.mrb[8].mxu1 }
 0x164   :  { %v933_v8 = vadd.f32 %v4029_v2, %v932_v4  ;;  %v1006_v9 = vadd.f32 %v4030_v3, %v1005_v5  ;;  %v4234_v10 = vpop.f32.mrb[9].mxu0  ;;  %v4239_v11 = vpop.f32.mrb[9].mxu1 }
 0x166   :  { %4311 = vmatpush3.xpose.msk.msra.mxu0 %vm206_vm1, %v933_v8  ;;  %4316 = vmatpush3.xpose.msk.msra.mxu1 %vm206_vm1, %v1006_v9 }
 0x167   :  { %v1078_v16 = vpop.f32.mrb[10].mxu0  ;;  %v1151_v17 = vpop.f32.mrb[10].mxu1  ;;  %4320 = vmatprep.subr.mxu0 %v4669_v0  ;;  %4325 = vmatprep.subr.mxu1 %v4669_v0 }
 0x168   :  { %v1079_v20 = vadd.f32 %v4031_v12, %v1078_v16  ;;  %v1152_v21 = vadd.f32 %v4032_v13, %v1151_v17  ;;  %v4244_v22 = vpop.f32.mrb[11].mxu0  ;;  %v4249_v23 = vpop.f32.mrb[11].mxu1 }
 0x169   :  { %4313 = vmatmul.mubr.msk.f32.vlgmr.msra.gmra.mrb[24].mxu0 %vm206_vm1, %v277_v14  ;;  %4318 = vmatmul.mubr.msk.f32.vlgmr.msra.gmra.mrb[24].mxu1 %vm206_vm1, %v350_v15 }
 0x16a   :  { %4321 = vmatpush3.xpose.msk.msra.mxu0 %vm206_vm1, %v1079_v20  ;;  %4326 = vmatpush3.xpose.msk.msra.mxu1 %vm206_vm1, %v1152_v21 }
 0x16b   :  { %v1224_v28 = vpop.f32.mrb[12].mxu0  ;;  %v1297_v29 = vpop.f32.mrb[12].mxu1  ;;  %4322 = vmatprep.mubr.msk.f32.mxu0 %vm4670_vm0, %v4669_v0  ;;  %4327 = vmatprep.mubr.msk.f32.mxu1 %vm4670_vm0, %v4669_v0 }
 0x16c   :  { %v1225_v32 = vadd.f32 %v4033_v24, %v1224_v28  ;;  %v1298_v33 = vadd.f32 %v4034_v25, %v1297_v29  ;;  %4330 = vmatprep.subr.mxu0 %v4669_v0  ;;  %4335 = vmatprep.subr.mxu1 %v4669_v0  ;;  %v4254_v34 = vpop.f32.mrb[13].mxu0  ;;  %v4259_v35 = vpop.f32.mrb[13].mxu1 }
 0x16d   :  { %4323 = vmatmul.mubr.msk.f32.vlgmr.msra.gmra.mrb[26].mxu0 %vm206_vm1, %v423_v26  ;;  %4328 = vmatmul.mubr.msk.f32.vlgmr.msra.gmra.mrb[26].mxu1 %vm206_vm1, %v496_v27 }
 0x16e   :  { %4331 = vmatpush3.xpose.msk.msra.mxu0 %vm206_vm1, %v1225_v32  ;;  %4336 = vmatpush3.xpose.msk.msra.mxu1 %vm206_vm1, %v1298_v33 }
 0x16f   :  { %v1370_v40 = vpop.f32.mrb[14].mxu0  ;;  %v1443_v41 = vpop.f32.mrb[14].mxu1  ;;  %4332 = vmatprep.mubr.msk.f32.mxu0 %vm4670_vm0, %v4669_v0  ;;  %4337 = vmatprep.mubr.msk.f32.mxu1 %vm4670_vm0, %v4669_v0 }
 0x170   :  { %v1371_v44 = vadd.f32 %v4035_v36, %v1370_v40  ;;  %v1444_v45 = vadd.f32 %v4036_v37, %v1443_v41  ;;  %4340 = vmatprep.subr.mxu0 %v4669_v0  ;;  %4345 = vmatprep.subr.mxu1 %v4669_v0  ;;  %v4264_v46 = vpop.f32.mrb[15].mxu0  ;;  %v4269_v47 = vpop.f32.mrb[15].mxu1 }
 0x171   :  { %4333 = vmatmul.mubr.msk.f32.vlgmr.msra.gmra.mrb[28].mxu0 %vm206_vm1, %v569_v38  ;;  %4338 = vmatmul.mubr.msk.f32.vlgmr.msra.gmra.mrb[28].mxu1 %vm206_vm1, %v642_v39 }
 0x172   :  { %4341 = vmatpush3.xpose.msk.msra.mxu0 %vm206_vm1, %v1371_v44  ;;  %4346 = vmatpush3.xpose.msk.msra.mxu1 %vm206_vm1, %v1444_v45 }
 0x173   :  { %4342 = vmatprep.mubr.msk.f32.mxu0 %vm4670_vm0, %v4669_v0  ;;  %4347 = vmatprep.mubr.msk.f32.mxu1 %vm4670_vm0, %v4669_v0  ;;  %v1588_v52 = vpop.f32.mrb[16].mxu0  ;;  %v1661_v55 = vpop.f32.mrb[16].mxu1 }
 0x174   :  { %4350 = vmatprep.subr.mxu0 %v4669_v0  ;;  %4355 = vmatprep.subr.mxu1 %v4669_v0  ;;  %v1589_v53 = vadd.f32 %v4045_v50, %v1588_v52  ;;  %v4274_v54 = vpop.f32.mrb[17].mxu0  ;;  %v1662_v56 = vadd.f32 %v4046_v51, %v1661_v55  ;;  %v4279_v57 = vpop.f32.mrb[17].mxu1 }
 0x175   :  { %4343 = vmatmul.mubr.msk.f32.vlgmr.msra.gmra.mrb[30].mxu0 %vm206_vm1, %v715_v48  ;;  %4348 = vmatmul.mubr.msk.f32.vlgmr.msra.gmra.mrb[30].mxu1 %vm206_vm1, %v788_v49 }
 0x176   :  { %4352 = vmatprep.mubr.msk.f32.mxu0 %vm4670_vm0, %v4669_v0  ;;  %4357 = vmatprep.mubr.msk.f32.mxu1 %vm4670_vm0, %v4669_v0 }
 0x177   :  { %4351 = vmatpush3.msra.mxu0 %v1589_v53  ;;  %v5060_v58 = vpop.f32.mrb[18].mxu0  ;;  %4356 = vmatpush3.msra.mxu1 %v1662_v56  ;;  %v5063_v60 = vpop.f32.mrb[18].mxu1 }
 0x178   :  { %4360 = vmatprep.subr.mxu0 %v4669_v0  ;;  %v4284_v59 = vpop.f32.mrb[19].mxu0  ;;  %4365 = vmatprep.subr.mxu1 %v4669_v0  ;;  %v4289_v61 = vpop.f32.mrb[19].mxu1 }
 0x17b   :  { %v5066_v62 = vpop.f32.mrb[20].mxu0 }
 0x17c   :  { %v4294_v63 = vpop.f32.mrb[21].mxu0  ;;  %v5068_v1 = vpop.f32.mrb[20].mxu1 }
 0x17d   :  { %v4299_v2 = vpop.f32.mrb[21].mxu1 }
 0x180   :  { %v5070_v3 = vpop.f32.mrb[22].mxu0  ;;  %v5072_v5 = vpop.f32.mrb[22].mxu1 }
 0x181   :  { %v4304_v4 = vpop.f32.mrb[23].mxu0  ;;  %v4309_v6 = vpop.f32.mrb[23].mxu1 }
 0x23c   :  { %v2175_v7 = vpop.f32.mrb[24].mxu0  ;;  %v2251_v8 = vpop.f32.mrb[24].mxu1 }
 0x23d   :  { %v4314_v9 = vpop.f32.mrb[25].mxu0  ;;  %v4319_v10 = vpop.f32.mrb[25].mxu1  ;;  %v2711_v11 = vsel %vm206_vm1, %v2175_v7, -inf  ;;  %v2714_v16 = vsel %vm206_vm1, %v2251_v8, -inf }
 0x23e   :  { %2712 = vmax.xlane.f32.xlu0 %v2711_v11 }
 0x240   :  { %v2327_v12 = vpop.f32.mrb[26].mxu0  ;;  %v2403_v13 = vpop.f32.mrb[26].mxu1 }
 0x241   :  { %v4324_v14 = vpop.f32.mrb[27].mxu0  ;;  %v4329_v15 = vpop.f32.mrb[27].mxu1  ;;  %v2717_v17 = vsel %vm206_vm1, %v2327_v12, -inf  ;;  %v2720_v22 = vsel %vm206_vm1, %v2403_v13, -inf }
 0x242   :  { %2715 = vmax.xlane.f32.xlu0 %v2714_v16  ;;  %2718 = vmax.xlane.f32.xlu1 %v2717_v17 }
 0x244   :  { %v2479_v18 = vpop.f32.mrb[28].mxu0  ;;  %v2555_v19 = vpop.f32.mrb[28].mxu1 }
 0x245   :  { %v4334_v20 = vpop.f32.mrb[29].mxu0  ;;  %v4339_v21 = vpop.f32.mrb[29].mxu1  ;;  %v2723_v23 = vsel %vm206_vm1, %v2479_v18, -inf  ;;  %v2726_v28 = vsel %vm206_vm1, %v2555_v19, -inf }
 0x246   :  { %2721 = vmax.xlane.f32.xlu1 %v2720_v22  ;;  %2724 = vmax.xlane.f32.xlu0 %v2723_v23 }
 0x248   :  { %v2631_v24 = vpop.f32.mrb[30].mxu0  ;;  %v2707_v25 = vpop.f32.mrb[30].mxu1 }
 0x249   :  { %v4344_v26 = vpop.f32.mrb[31].mxu0  ;;  %v4349_v27 = vpop.f32.mrb[31].mxu1  ;;  %v2729_v29 = vsel %vm206_vm1, %v2631_v24, -inf  ;;  %v2732_v30 = vsel %vm206_vm1, %v2707_v25, -inf }
 0x24a   :  { %2727 = vmax.xlane.f32.xlu1 %v2726_v28  ;;  %2730 = vmax.xlane.f32.xlu0 %v2729_v29  ;;  %v4049_v27 = vld [vmem:[%s5208_s8 + $0x4] ss:$0 sm:$0xff] }
 0x24e   :  { %2733 = vmax.xlane.f32.xlu1 %v2732_v30 }
 0x2cb   :  { %v2713_v31 = vpop.xlane.xlu0 %2712 }
 0x2cc   :  { %v2735_v32 = vsub.f32 %v2175_v7, %v2713_v31 }
 0x2ce   :  { %v2743_v33 = vmul.f32 1.442695, %v2735_v32  ;;  %v1881_v32 = vadd.f32 %v4049_v27, %v5066_v62 }
 0x2cf   :  { %v2716_v34 = vpop.xlane.xlu0 %2715  ;;  %v2719_v35 = vpop.xlane.xlu1 %2718 }
 0x2d0   :  { %4442 = vpow2.f32 %v2743_v33  ;;  %v2736_v36 = vsub.f32 %v2251_v8, %v2716_v34  ;;  %v2737_v37 = vsub.f32 %v2327_v12, %v2719_v35  ;;  %v4050_v33 = vld [vmem:[%s5208_s8 + $0x5] ss:$0 sm:$0xff]  ;;  %v4051_v35 = vld [vmem:[%s5208_s8 + $0x6] ss:$0 sm:$0xff] }
 0x2d1   :  { %v1954_v62 = vadd.f32 %v4050_v33, %v5068_v1 }
 0x2d2   :  { %v2745_v38 = vmul.f32 1.442695, %v2736_v36  ;;  %v2747_v39 = vmul.f32 1.442695, %v2737_v37 }
 0x2d3   :  { %v2722_v40 = vpop.xlane.xlu1 %2721  ;;  %v2725_v41 = vpop.xlane.xlu0 %2724 }
 0x2d4   :  { %4444 = vpow2.f32 %v2745_v38  ;;  %v2738_v42 = vsub.f32 %v2403_v13, %v2722_v40  ;;  %v2739_v43 = vsub.f32 %v2479_v18, %v2725_v41  ;;  %v2027_v38 = vadd.f32 %v4051_v35, %v5070_v3 }
 0x2d5   :  { %4446 = vpow2.f32 %v2747_v39  ;;  %v4052_v39 = vld [vmem:[%s5208_s8 + $0x7] ss:$0 sm:$0xff] }
 0x2d6   :  { %v2749_v44 = vmul.f32 1.442695, %v2738_v42  ;;  %v2751_v45 = vmul.f32 1.442695, %v2739_v43  ;;  %v2100_v3 = vadd.f32 %v4052_v39, %v5072_v5  ;;  %v3383_v5 = vld [vmem:[#allocation13] sm:$0xff] }
 0x2d7   :  { %v2728_v46 = vpop.xlane.xlu1 %2727  ;;  %v2731_v47 = vpop.xlane.xlu0 %2730 }
 0x2d8   :  { %4448 = vpow2.f32 %v2749_v44  ;;  %v2740_v48 = vsub.f32 %v2555_v19, %v2728_v46  ;;  %v2741_v49 = vsub.f32 %v2631_v24, %v2731_v47  ;;  %v4047_v19 = vld [vmem:[%s5208_s8 + $0x2] ss:$0 sm:$0xff]  ;;  %v3385_v46 = vld [vmem:[#allocation13 + $0x10] sm:$0xff] }
 0x2d9   :  { %4450 = vpow2.f32 %v2751_v45  ;;  %v1735_v23 = vadd.f32 %v4047_v19, %v5060_v58  ;;  %v3384_v45 = vld [vmem:[#allocation13 + $0x8] sm:$0xff] }
 0x2da   :  { %v4443_v50 = vpop.eup %4442  ;;  %v2753_v51 = vmul.f32 1.442695, %v2740_v48  ;;  %v2755_v52 = vmul.f32 1.442695, %v2741_v49  ;;  %v3386_v49 = vld [vmem:[#allocation13 + $0x18] sm:$0xff] }
 0x2db   :  { %v2734_v53 = vpop.xlane.xlu1 %2733  ;;  %v2759_v54 = vsel %vm206_vm1, %v4443_v50, 0.0 }
 0x2dc   :  { %4452 = vpow2.f32 %v2753_v51  ;;  %v2742_v55 = vsub.f32 %v2707_v25, %v2734_v53  ;;  %2760 = vadd.xlane.f32.xlu0 %v2759_v54  ;;  %v4048_v25 = vld [vmem:[%s5208_s8 + $0x3] ss:$0 sm:$0xff] }
 0x2dd   :  { %4454 = vpow2.f32 %v2755_v52  ;;  %v1808_v30 = vadd.f32 %v4048_v25, %v5063_v60  ;;  %v3387_v51 = vld [vmem:[#allocation13 + $0x20] sm:$0xff] }
 0x2de   :  { %v4445_v56 = vpop.eup %4444  ;;  %v2757_v57 = vmul.f32 1.442695, %v2742_v55  ;;  %v3388_v55 = vld [vmem:[#allocation13 + $0x28] sm:$0xff] }
 0x2df   :  { %v4447_v59 = vpop.eup %4446  ;;  %v2762_v61 = vsel %vm206_vm1, %v4445_v56, 0.0 }
 0x2e0   :  { %4456 = vpow2.f32 %v2757_v57  ;;  %2763 = vadd.xlane.f32.xlu1 %v2762_v61  ;;  %v2765_v63 = vsel %vm206_vm1, %v4447_v59, 0.0  ;;  %v3389_v57 = vld [vmem:[#allocation13 + $0x30] sm:$0xff] }
 0x2e1   :  { %2766 = vadd.xlane.f32.xlu0 %v2765_v63 }
 0x2e2   :  { %v4449_v2 = vpop.eup %4448 }
 0x2e3   :  { %v4451_v4 = vpop.eup %4450  ;;  %v2768_v6 = vsel %vm206_vm1, %v4449_v2, 0.0 }
 0x2e4   :  { %2769 = vadd.xlane.f32.xlu1 %v2768_v6  ;;  %v2771_v7 = vsel %vm206_vm1, %v4451_v4, 0.0 }
 0x2e5   :  { %2772 = vadd.xlane.f32.xlu0 %v2771_v7 }
 0x2e6   :  { %v5087_v8 = vpop.eup %4452 }
 0x2e7   :  { %v5089_v9 = vpop.eup %4454  ;;  %v2774_v10 = vsel %vm206_vm1, %v5087_v8, 0.0 }
 0x2e8   :  { %2775 = vadd.xlane.f32.xlu1 %v2774_v10  ;;  %v2777_v11 = vsel %vm206_vm1, %v5089_v9, 0.0 }
 0x2e9   :  { %2778 = vadd.xlane.f32.xlu0 %v2777_v11 }
 0x2ea   :  { %v5095_v12 = vpop.eup %4456 }
 0x2eb   :  { %v2780_v13 = vsel %vm206_vm1, %v5095_v12, 0.0 }
 0x2ec   :  { %2781 = vadd.xlane.f32.xlu1 %v2780_v13 }
 0x369   :  { %v2761_v14 = vpop.xlane.xlu0 %2760 }
 0x36a   :  { %4458 = vrcp.f32 %v2761_v14 }
 0x36d   :  { %v2764_v15 = vpop.xlane.xlu1 %2763 }
 0x36e   :  { %4460 = vrcp.f32 %v2764_v15  ;;  %v2767_v16 = vpop.xlane.xlu0 %2766 }
 0x36f   :  { %4462 = vrcp.f32 %v2767_v16 }
 0x371   :  { %v2770_v17 = vpop.xlane.xlu1 %2769 }
 0x372   :  { %4464 = vrcp.f32 %v2770_v17  ;;  %v2773_v18 = vpop.xlane.xlu0 %2772 }
 0x373   :  { %4466 = vrcp.f32 %v2773_v18 }
 0x374   :  { %v4459_v20 = vpop.eup %4458 }
 0x375   :  { %v2791_v21 = vmul.f32 %v4459_v20, %v4443_v50  ;;  %v2776_v22 = vpop.xlane.xlu1 %2775 }
 0x376   :  { %4468 = vrcp.f32 %v2776_v22  ;;  %v2779_v24 = vpop.xlane.xlu0 %2778 }
 0x377   :  { %4470 = vrcp.f32 %v2779_v24  ;;  %4353 = vmatmul.mubr.msk.f32.vlgmr.msra.gmra.mrb[32].mxu0 %vm206_vm1, %v2791_v21 }
 0x378   :  { %v4461_v26 = vpop.eup %4460  ;;  %4361 = vmatpush3.msra.mxu0 %v1735_v23  ;;  %4362 = vmatprep.mubr.msk.f32.mxu0 %vm4670_vm0, %v4669_v0 }
 0x379   :  { %v4463_v28 = vpop.eup %4462  ;;  %v2792_v58 = vmul.f32 %v4461_v26, %v4445_v56  ;;  %v2782_v29 = vpop.xlane.xlu1 %2781  ;;  %4370 = vmatprep.subr.mxu0 %v4669_v0  ;;  %v4093_v26 = vld [vmem:[%s5210_s10] ss:$0 sm:$0xff] }
 0x37a   :  { %v2793_v31 = vmul.f32 %v4463_v28, %v4447_v59  ;;  %4472 = vrcp.f32 %v2782_v29 }
 0x37b   :  { %4358 = vmatmul.mubr.msk.f32.vlgmr.msra.gmra.mrb[32].mxu1 %vm206_vm1, %v2792_v58 }
 0x37c   :  { %v4465_v34 = vpop.eup %4464  ;;  %4363 = vmatmul.mubr.msk.f32.vlgmr.msra.gmra.mrb[34].mxu0 %vm206_vm1, %v2793_v31  ;;  %4366 = vmatpush3.msra.mxu1 %v1808_v30 }
 0x37d   :  { %v4467_v36 = vpop.eup %4466  ;;  %v2794_v60 = vmul.f32 %v4465_v34, %v4449_v2  ;;  %4371 = vmatpush3.msra.mxu0 %v1881_v32  ;;  %4367 = vmatprep.mubr.msk.f32.mxu1 %vm4670_vm0, %v4669_v0  ;;  %v3390_v2 = vld [vmem:[#allocation13 + $0x38] sm:$0xff] }
 0x37e   :  { %v2795_v37 = vmul.f32 %v4467_v36, %v4451_v4  ;;  %4372 = vmatprep.mubr.msk.f32.mxu0 %vm4670_vm0, %v4669_v0  ;;  %4375 = vmatprep.subr.mxu1 %v4669_v0 }
 0x37f   :  { %4380 = vmatprep.subr.mxu0 %v4669_v0  ;;  %4368 = vmatmul.mubr.msk.f32.vlgmr.msra.gmra.mrb[34].mxu1 %vm206_vm1, %v2794_v60 }
 0x380   :  { %v4469_v40 = vpop.eup %4468  ;;  %4373 = vmatmul.mubr.msk.f32.vlgmr.msra.gmra.mrb[36].mxu0 %vm206_vm1, %v2795_v37  ;;  %4376 = vmatpush3.msra.mxu1 %v1954_v62 }
 0x381   :  { %v4471_v1 = vpop.eup %4470  ;;  %v2796_v41 = vmul.f32 %v4469_v40, %v5087_v8  ;;  %4381 = vmatpush3.msra.mxu0 %v2027_v38  ;;  %4377 = vmatprep.mubr.msk.f32.mxu1 %vm4670_vm0, %v4669_v0 }
 0x382   :  { %v2797_v42 = vmul.f32 %v4471_v1, %v5089_v9  ;;  %4382 = vmatprep.mubr.msk.f32.mxu0 %vm4670_vm0, %v4669_v0  ;;  %4385 = vmatprep.subr.mxu1 %v4669_v0 }
 0x383   :  { %4378 = vmatmul.mubr.msk.f32.vlgmr.msra.gmra.mrb[36].mxu1 %vm206_vm1, %v2796_v41  ;;  %4390 = vmatprep.subr.mxu0 %v4669_v0 }
 0x384   :  { %v4473_v43 = vpop.eup %4472  ;;  %4383 = vmatmul.mubr.msk.f32.vlgmr.msra.gmra.mrb[38].mxu0 %vm206_vm1, %v2797_v42  ;;  %4386 = vmatpush3.msra.mxu1 %v2100_v3 }
 0x385   :  { %v2798_v44 = vmul.f32 %v4473_v43, %v5095_v12  ;;  %4387 = vmatprep.mubr.msk.f32.mxu1 %vm4670_vm0, %v4669_v0  ;;  %4392 = vmatprep.mubr.msk.f32.mxu0 %vm4670_vm0, %v4669_v0 }
 0x386   :  { %4395 = vmatprep.subr.mxu1 %v4669_v0  ;;  %4391 = vmatpush3.msra.mxu0 %v3383_v5 }
 0x387   :  { %4388 = vmatmul.mubr.msk.f32.vlgmr.msra.gmra.mrb[38].mxu1 %vm206_vm1, %v2798_v44  ;;  %4400 = vmatprep.subr.mxu0 %v4669_v0 }
 0x388   :  { %4397 = vmatprep.mubr.msk.f32.mxu1 %vm4670_vm0, %v4669_v0  ;;  %4396 = vmatpush3.msra.mxu1 %v3384_v45 }
 0x389   :  { %4405 = vmatprep.subr.mxu1 %v4669_v0 }
 0x44a   :  { %v2868_v47 = vpop.f32.mrb[32].mxu0 }
 0x44b   :  { %v4354_v48 = vpop.f32.mrb[33].mxu0  ;;  %4393 = vmatmul.mubr.msk.f32.vlgmr.msra.gmra.mrb[40].mxu0 %vm206_vm1, %v2868_v47 }
 0x44c   :  { %4401 = vmatpush3.msra.mxu0 %v3385_v46  ;;  %4402 = vmatprep.mubr.msk.f32.mxu0 %vm4670_vm0, %v4669_v0 }
 0x44d   :  { %4410 = vmatprep.subr.mxu0 %v4669_v0 }
 0x44e   :  { %v2941_v50 = vpop.f32.mrb[32].mxu1 }
 0x44f   :  { %v3014_v52 = vpop.f32.mrb[34].mxu0  ;;  %v4359_v53 = vpop.f32.mrb[33].mxu1  ;;  %4398 = vmatmul.mubr.msk.f32.vlgmr.msra.gmra.mrb[40].mxu1 %vm206_vm1, %v2941_v50 }
 0x450   :  { %v4364_v54 = vpop.f32.mrb[35].mxu0  ;;  %4403 = vmatmul.mubr.msk.f32.vlgmr.msra.gmra.mrb[42].mxu0 %vm206_vm1, %v3014_v52  ;;  %4406 = vmatpush3.msra.mxu1 %v3386_v49 }
 0x451   :  { %4407 = vmatprep.mubr.msk.f32.mxu1 %vm4670_vm0, %v4669_v0  ;;  %4411 = vmatpush3.msra.mxu0 %v3387_v51 }
 0x452   :  { %v3087_v56 = vpop.f32.mrb[34].mxu1  ;;  %4412 = vmatprep.mubr.msk.f32.mxu0 %vm4670_vm0, %v4669_v0  ;;  %4415 = vmatprep.subr.mxu1 %v4669_v0 }
 0x453   :  { %v3160_v59 = vpop.f32.mrb[36].mxu0  ;;  %v4369_v61 = vpop.f32.mrb[35].mxu1  ;;  %4408 = vmatmul.mubr.msk.f32.vlgmr.msra.gmra.mrb[42].mxu1 %vm206_vm1, %v3087_v56  ;;  %4420 = vmatprep.subr.mxu0 %v4669_v0 }
 0x454   :  { %v4374_v63 = vpop.f32.mrb[37].mxu0  ;;  %4413 = vmatmul.mubr.msk.f32.vlgmr.msra.gmra.mrb[44].mxu0 %vm206_vm1, %v3160_v59  ;;  %4416 = vmatpush3.msra.mxu1 %v3388_v55 }
 0x455   :  { %4417 = vmatprep.mubr.msk.f32.mxu1 %vm4670_vm0, %v4669_v0  ;;  %4421 = vmatpush3.msra.mxu0 %v3389_v57 }
 0x456   :  { %v3233_v4 = vpop.f32.mrb[36].mxu1  ;;  %4422 = vmatprep.mubr.msk.f32.mxu0 %vm4670_vm0, %v4669_v0  ;;  %4425 = vmatprep.subr.mxu1 %v4669_v0 }
 0x457   :  { %v3306_v6 = vpop.f32.mrb[38].mxu0  ;;  %v4379_v7 = vpop.f32.mrb[37].mxu1  ;;  %4418 = vmatmul.mubr.msk.f32.vlgmr.msra.gmra.mrb[44].mxu1 %vm206_vm1, %v3233_v4 }
 0x458   :  { %v4384_v8 = vpop.f32.mrb[39].mxu0  ;;  %4423 = vmatmul.mubr.msk.f32.vlgmr.msra.gmra.mrb[46].mxu0 %vm206_vm1, %v3306_v6  ;;  %4426 = vmatpush3.msra.mxu1 %v3390_v2 }
 0x459   :  { %4427 = vmatprep.mubr.msk.f32.mxu1 %vm4670_vm0, %v4669_v0 }
 0x45a   :  { %v3379_v9 = vpop.f32.mrb[38].mxu1 }
 0x45b   :  { %v4389_v10 = vpop.f32.mrb[39].mxu1  ;;  %4428 = vmatmul.mubr.msk.f32.vlgmr.msra.gmra.mrb[46].mxu1 %vm206_vm1, %v3379_v9 }
 0x51e   :  { %v3460_v11 = vpop.f32.mrb[40].mxu0 }
 0x51f   :  { %v4394_v12 = vpop.f32.mrb[41].mxu0 }
 0x522   :  { %v3533_v13 = vpop.f32.mrb[40].mxu1 }
 0x523   :  { %v3606_v14 = vpop.f32.mrb[42].mxu0  ;;  %v4399_v15 = vpop.f32.mrb[41].mxu1 }
 0x524   :  { %v3975_v16 = vadd.f32 %v3606_v14, %v3460_v11  ;;  %v4404_v17 = vpop.f32.mrb[43].mxu0 }
 0x526   :  { %v3679_v18 = vpop.f32.mrb[42].mxu1 }
 0x527   :  { %v3976_v19 = vadd.f32 %v3679_v18, %v3533_v13  ;;  %v3752_v20 = vpop.f32.mrb[44].mxu0  ;;  %v4409_v21 = vpop.f32.mrb[43].mxu1 }
 0x528   :  { %v3977_v22 = vadd.f32 %v3975_v16, %v3752_v20  ;;  %v4414_v23 = vpop.f32.mrb[45].mxu0 }
 0x52a   :  { %v3825_v24 = vpop.f32.mrb[44].mxu1 }
 0x52b   :  { %v3978_v25 = vadd.f32 %v3976_v19, %v3825_v24  ;;  %v3898_v0 = vpop.f32.mrb[46].mxu0  ;;  %v4419_v27 = vpop.f32.mrb[45].mxu1 }
 0x52c   :  { %v3979_v28 = vadd.f32 %v3977_v22, %v3898_v0  ;;  %v4424_v58 = vpop.f32.mrb[47].mxu0 }
 0x52e   :  { %v3988_v29 = vadd.f32 %v4093_v26, %v3979_v28  ;;  %v3971_v30 = vpop.f32.mrb[46].mxu1 }
 0x52f   :  { %v3980_v31 = vadd.f32 %v3978_v25, %v3971_v30  ;;  %v4429_v32 = vpop.f32.mrb[47].mxu1 }
 0x530   :  { %3991 = vst.msk [vmem:[#allocation14] sm:$0xff] %vm3990_vm2, %v3988_v29 }
 0x531   :  { %v3989_v33 = vadd.f32 %v4093_v26, %v3980_v31 }
 0x533   :  { %3992 = vst.msk [vmem:[#allocation14 + $0x8] sm:$0xff] %vm3990_vm2, %v3989_v33 }
 0x534   :  { %4639 = shalt.err (!%p4636_p4)
}
 0x535   :  { %s4640_s18 = scalar_lea.hbm %s5211_s11, 256 }
 0x536   :  { %p4641_p5 = scmp.ne.s32.totalorder %s5211_s11, %s4640_s18  ;;  %p4644_p6 = scmp.lt.u32.totalorder %s4640_s18, %s5211_s11 }
 0x538   :  { %p4646_p7 = pnand %p4644_p6, %p4641_p5 }
 0x53a   :  { %4649 = shalt.err (!%p4646_p7)
}
 0x53b   :  { %4004 = dma.vmem_to_hbm [thread:$0]  %s3999_s9, 256, %s5211_s11, [#allocation4], %s4662_s29, %s4662_s29, %s4663_s30  }
 0x53c   :  { %4658 = dma.done.wait [#allocation4], 256  }
 0x53d   :  { %4659 = vsyncadd [#allocation4], 4294967040 }
 0x53e   :  { %4008 = vsyncpa [#allocation3], 1 }
 0x53f   :  { %4009 = vsyncpa [#allocation6], 1 }
 0x540   :  { %4010 = vsyncpa [#allocation9], 1 }
 0x541   :  { %4011 = vsyncpa [#allocation12], 1 }
 0x542   :  { %4012 = vsyncpa [#allocation4], 1 }

</bundles_post_ra>
